<compile_context>
chip_gen: v6e
topology: v6e:2x2x1
jax: 0.10.0
libtpu: 0.0.40
codegen_flags: <defaults>
</compile_context>

<pallas_src>
import jax
import jax.numpy as jnp
from jax.experimental import pallas as pl
from jax.experimental.pallas import tpu as pltpu

LN_EPS = 1e-5  # PyTorch nn.LayerNorm default


def embeddings_kernel(ids_ref, table_hbm, pos_ref, gamma_ref, beta_ref,
                      out_ref, rows_ref, sem):
    """Grid step (b, j): gather TM rows (double-buffered), add pos, LayerNorm."""
    b = pl.program_id(0)           # batch row            (parallel axis)
    j = pl.program_id(1)           # token tile in batch  (arbitrary axis)
    n_inner = pl.num_programs(1)   # tiles per batch row == S // TM
    _, TM, D = rows_ref.shape
    slot = jax.lax.rem(j, 2)

    # Chunk-unroll descriptor issue (fully for small tiles).
    unroll = True if TM <= 64 else 8

    def issue_tile(tile_j, slot_idx):
        """Issue TM row-gather DMAs (table row -> rows_ref[slot_idx, t])."""
        base = (b * n_inner + tile_j) * TM

        def body(t, carry):
            tok = ids_ref[base + t]                        # SMEM scalar read
            pltpu.make_async_copy(
                table_hbm.at[pl.ds(tok, 1), :],            # (1, D) row in HBM
                rows_ref.at[slot_idx, pl.ds(t, 1), :],     # (1, D) VMEM slot
                sem.at[slot_idx],
            ).start()
            return carry

        jax.lax.fori_loop(0, TM, body, 0, unroll=unroll)

    # Prime the pipeline: the first tile of *this* batch row gathers itself.
    # (Condition is on the innermost/arbitrary axis, so it fires once per
    #  batch row on whichever core runs it -> megacore-safe.)
    @pl.when(j == 0)
    def _():
        issue_tile(0, 0)

    # Prefetch the next tile's rows into the other slot; overlaps the wait and
    # the LayerNorm compute below.
    @pl.when(j + 1 < n_inner)
    def _():
        issue_tile(j + 1, 1 - slot)

    # ONE aggregate wait: TM copies of (1, D) bytes == a single (TM, D)
    # descriptor's byte count on this slot's semaphore.
    pltpu.make_async_copy(rows_ref.at[slot], rows_ref.at[slot],
                          sem.at[slot]).wait()

    # ---- Positional add + LayerNorm (feature axis) + affine ----------------
    start = pl.multiple_of(j * TM, TM)                     # aligned slice hint
    rows = rows_ref[slot].astype(jnp.float32)              # (TM, D)
    emb = rows + pos_ref[pl.ds(start, TM), :]              # resident pos slice
    mean = jnp.mean(emb, axis=-1, keepdims=True)
    cent = emb - mean
    var = jnp.mean(cent * cent, axis=-1, keepdims=True)
    normed = cent * jax.lax.rsqrt(var + LN_EPS)            # rsqrt on the EUP
    out = normed * gamma_ref[...] + beta_ref[...]

    # Dropout: eval mode == identity.
    out_ref[0] = out.astype(out_ref.dtype)


def _pick_tile_rows(seq_len):
    """Token-tile size: biggest that divides S and is a multiple of 8."""
    for tm in (512, 256, 128, 64, 32, 16, 8):
        if seq_len % tm == 0:
            return tm
    raise ValueError("seq_len must be a multiple of 8 for this kernel")


def embeddings_forward(ids, table, pos_enc, gamma, beta, *, out_dtype=None):
    """ids: [B, S] int; table: [V, D]; pos_enc: [1, max_seq, D]; gamma/beta: [D].

    out_dtype lets a downstream layer request bf16 output (halves writeback);
    defaults to the table dtype to match the PyTorch module exactly.
    """
    B, S = ids.shape
    V, D = table.shape
    TM = _pick_tile_rows(S)
    n_inner = S // TM
    assert TM % 8 == 0 and S % TM == 0
    out_dtype = table.dtype if out_dtype is None else out_dtype

    # NOTE: ids are scalar-prefetched into SMEM (O(B*S) ints).  Fine at
    # moderate batch*seq; for very large N switch to per-tile SMEM blocks.
    ids_flat = ids.reshape(B * S).astype(jnp.int32)
    pos = pos_enc[0, :S, :].astype(jnp.float32)            # (S, D) actually used
    gamma2 = gamma.reshape(1, D).astype(jnp.float32)
    beta2 = beta.reshape(1, D).astype(jnp.float32)

    grid_spec = pltpu.PrefetchScalarGridSpec(
        num_scalar_prefetch=1,
        grid=(B, n_inner),
        in_specs=[
            pl.BlockSpec(memory_space=pl.ANY),                 # table stays in HBM
            pl.BlockSpec((S, D), lambda b, j, ids: (0, 0)),    # pos: VMEM-resident
            pl.BlockSpec((1, D), lambda b, j, ids: (0, 0)),    # gamma (resident)
            pl.BlockSpec((1, D), lambda b, j, ids: (0, 0)),    # beta  (resident)
        ],
        out_specs=pl.BlockSpec((1, TM, D), lambda b, j, ids: (b, j, 0)),
        scratch_shapes=[
            pltpu.VMEM((2, TM, D), table.dtype),   # double-buffered gathered rows
            pltpu.SemaphoreType.DMA((2,)),         # one semaphore per buffer slot
        ],
    )

    out = pl.pallas_call(
        embeddings_kernel,
        out_shape=jax.ShapeDtypeStruct((B, S, D), out_dtype),
        grid_spec=grid_spec,
        compiler_params=pltpu.CompilerParams(
            dimension_semantics=("parallel", "arbitrary")),
    )(ids_flat, table, pos, gamma2, beta2)

    return out


def embeddings_reference(ids, table, pos_enc, gamma, beta):
    """Pure-JAX reference of the PyTorch forward (eval mode)."""
    S = ids.shape[1]
    emb = table[ids]                                        # [B, S, D]
    emb = emb + pos_enc[:, :S, :]
    mean = jnp.mean(emb, axis=-1, keepdims=True)
    var = jnp.mean((emb - mean) ** 2, axis=-1, keepdims=True)
    normed = (emb - mean) * jax.lax.rsqrt(var + LN_EPS)
    return normed * gamma + beta


if __name__ == "__main__":
    # Small, module-consistent shapes (d_model=128 keeps the output lane-dense).
    batch = 2
    seq_len = 8
    vocab_size = 64
    d_model = 128
    max_seq_length = 16

    key = jax.random.PRNGKey(0)
    k_ids, k_table, k_pos = jax.random.split(key, 3)

    # Deterministic parameter init (shapes from Embeddings.__init__).
    table = jax.random.normal(k_table, (vocab_size, d_model), dtype=jnp.float32)
    # position_encoding is nn.Parameter(torch.zeros(...)); use small nonzero
    # values so the positional-add path is actually exercised.
    pos_enc = 0.02 * jax.random.normal(
        k_pos, (1, max_seq_length, d_model), dtype=jnp.float32
    )
    gamma = jnp.ones((d_model,), dtype=jnp.float32)   # nn.LayerNorm weight
    beta = jnp.zeros((d_model,), dtype=jnp.float32)   # nn.LayerNorm bias

    ids = jax.random.randint(k_ids, (batch, seq_len), 0, vocab_size,
                             dtype=jnp.int32)

    out = embeddings_forward(ids, table, pos_enc, gamma, beta)
    out = jax.block_until_ready(out)

    ref = embeddings_reference(ids, table, pos_enc, gamma, beta)
    assert out.shape == (batch, seq_len, d_model)
    assert jnp.allclose(out, ref, atol=1e-5, rtol=1e-5), "mismatch vs reference"

    print("KERNEL_OK")
</pallas_src>

<mosaic_0001>
module attributes {stable_mosaic.version = 11 : i64} {
  func.func @embeddings_kernel(%arg0: i32, %arg1: i32, %arg2: memref<16xi32, #tpu.memory_space<smem>>, %arg3: memref<64x128xf32, #tpu.memory_space<any>>, %arg4: memref<8x128xf32, #tpu.memory_space<vmem>>, %arg5: memref<1x128xf32, #tpu.memory_space<vmem>>, %arg6: memref<1x128xf32, #tpu.memory_space<vmem>>, %arg7: memref<1x8x128xf32, #tpu.memory_space<vmem>>, %arg8: memref<2x8x128xf32, #tpu.memory_space<vmem>>, %arg9: memref<2x!tpu.dma_semaphore, #tpu.memory_space<semaphore_mem>>) attributes {dimension_semantics = [#tpu.dimension_semantics<parallel>, #tpu.dimension_semantics<arbitrary>], iteration_bounds = array<i64: 2, 1>, scalar_prefetch = 1 : i64, scratch_operands = 2 : i64, tpu.core_type = #tpu.core_type<tc>, window_params = [{}, {pipeline_mode = #tpu.pipeline_mode<synchronous>, transform_indices = @transform_1, window_bounds = array<i64: 8, 128>}, {pipeline_mode = #tpu.pipeline_mode<synchronous>, transform_indices = @transform_2, window_bounds = array<i64: 1, 128>}, {pipeline_mode = #tpu.pipeline_mode<synchronous>, transform_indices = @transform_3, window_bounds = array<i64: 1, 128>}, {transform_indices = @transform_4, window_bounds = array<i64: 1, 8, 128>}]} {
    %c2_i32 = arith.constant 2 : i32
    %0 = arith.remsi %arg1, %c2_i32 : i32
    %c0_i32 = arith.constant 0 : i32
    %1 = arith.cmpi eq, %arg1, %c0_i32 : i32
    %2 = arith.extui %1 : i1 to i32
    %c0_i32_0 = arith.constant 0 : i32
    %3 = arith.cmpi ne, %2, %c0_i32_0 : i32
    scf.if %3 {
      %c1_i32_20 = arith.constant 1 : i32
      %47 = arith.muli %arg0, %c1_i32_20 : i32
      %c0_i32_21 = arith.constant 0 : i32
      %48 = arith.addi %47, %c0_i32_21 : i32
      %c8_i32_22 = arith.constant 8 : i32
      %49 = arith.muli %48, %c8_i32_22 : i32
      %c0_i32_23 = arith.constant 0 : i32
      %50 = arith.addi %49, %c0_i32_23 : i32
      %51 = arith.index_cast %50 : i32 to index
      %52 = memref.load %arg2[%51] : memref<16xi32, #tpu.memory_space<smem>>
      %c0_i32_24 = arith.constant 0 : i32
      %c0_i32_25 = arith.constant 0 : i32
      %c0_i32_26 = arith.constant 0 : i32
      %53 = tpu.memref_slice %arg3[%52, %c0_i32_26] : memref<64x128xf32, #tpu.memory_space<any>> -> memref<1x128xf32, #tpu.memory_space<any>>
      %c0_i32_27 = arith.constant 0 : i32
      %54 = tpu.memref_slice %arg8[%c0_i32_24, %c0_i32_23, %c0_i32_27] : memref<2x8x128xf32, #tpu.memory_space<vmem>> -> memref<1x1x128xf32, #tpu.memory_space<vmem>>
      %55 = tpu.memref_squeeze %54 : memref<1x1x128xf32, #tpu.memory_space<vmem>> -> memref<1x128xf32, #tpu.memory_space<vmem>>
      %56 = tpu.memref_slice %arg9[%c0_i32_25] : memref<2x!tpu.dma_semaphore, #tpu.memory_space<semaphore_mem>> -> memref<1x!tpu.dma_semaphore, #tpu.memory_space<semaphore_mem>>
      %57 = tpu.memref_squeeze %56 : memref<1x!tpu.dma_semaphore, #tpu.memory_space<semaphore_mem>> -> memref<!tpu.dma_semaphore, #tpu.memory_space<semaphore_mem>>
      tpu.enqueue_dma source(%53 : memref<1x128xf32, #tpu.memory_space<any>>) target(%55 : memref<1x128xf32, #tpu.memory_space<vmem>>) target_semaphore(%57 : memref<!tpu.dma_semaphore, #tpu.memory_space<semaphore_mem>>)
      %c1_i32_28 = arith.constant 1 : i32
      %58 = arith.addi %49, %c1_i32_28 : i32
      %59 = arith.index_cast %58 : i32 to index
      %60 = memref.load %arg2[%59] : memref<16xi32, #tpu.memory_space<smem>>
      %c0_i32_29 = arith.constant 0 : i32
      %c0_i32_30 = arith.constant 0 : i32
      %c0_i32_31 = arith.constant 0 : i32
      %61 = tpu.memref_slice %arg3[%60, %c0_i32_31] : memref<64x128xf32, #tpu.memory_space<any>> -> memref<1x128xf32, #tpu.memory_space<any>>
      %c0_i32_32 = arith.constant 0 : i32
      %62 = tpu.memref_slice %arg8[%c0_i32_29, %c1_i32_28, %c0_i32_32] : memref<2x8x128xf32, #tpu.memory_space<vmem>> -> memref<1x1x128xf32, #tpu.memory_space<vmem>>
      %63 = tpu.memref_squeeze %62 : memref<1x1x128xf32, #tpu.memory_space<vmem>> -> memref<1x128xf32, #tpu.memory_space<vmem>>
      %64 = tpu.memref_slice %arg9[%c0_i32_30] : memref<2x!tpu.dma_semaphore, #tpu.memory_space<semaphore_mem>> -> memref<1x!tpu.dma_semaphore, #tpu.memory_space<semaphore_mem>>
      %65 = tpu.memref_squeeze %64 : memref<1x!tpu.dma_semaphore, #tpu.memory_space<semaphore_mem>> -> memref<!tpu.dma_semaphore, #tpu.memory_space<semaphore_mem>>
      tpu.enqueue_dma source(%61 : memref<1x128xf32, #tpu.memory_space<any>>) target(%63 : memref<1x128xf32, #tpu.memory_space<vmem>>) target_semaphore(%65 : memref<!tpu.dma_semaphore, #tpu.memory_space<semaphore_mem>>)
      %c2_i32_33 = arith.constant 2 : i32
      %66 = arith.addi %49, %c2_i32_33 : i32
      %67 = arith.index_cast %66 : i32 to index
      %68 = memref.load %arg2[%67] : memref<16xi32, #tpu.memory_space<smem>>
      %c0_i32_34 = arith.constant 0 : i32
      %c0_i32_35 = arith.constant 0 : i32
      %c0_i32_36 = arith.constant 0 : i32
      %69 = tpu.memref_slice %arg3[%68, %c0_i32_36] : memref<64x128xf32, #tpu.memory_space<any>> -> memref<1x128xf32, #tpu.memory_space<any>>
      %c0_i32_37 = arith.constant 0 : i32
      %70 = tpu.memref_slice %arg8[%c0_i32_34, %c2_i32_33, %c0_i32_37] : memref<2x8x128xf32, #tpu.memory_space<vmem>> -> memref<1x1x128xf32, #tpu.memory_space<vmem>>
      %71 = tpu.memref_squeeze %70 : memref<1x1x128xf32, #tpu.memory_space<vmem>> -> memref<1x128xf32, #tpu.memory_space<vmem>>
      %72 = tpu.memref_slice %arg9[%c0_i32_35] : memref<2x!tpu.dma_semaphore, #tpu.memory_space<semaphore_mem>> -> memref<1x!tpu.dma_semaphore, #tpu.memory_space<semaphore_mem>>
      %73 = tpu.memref_squeeze %72 : memref<1x!tpu.dma_semaphore, #tpu.memory_space<semaphore_mem>> -> memref<!tpu.dma_semaphore, #tpu.memory_space<semaphore_mem>>
      tpu.enqueue_dma source(%69 : memref<1x128xf32, #tpu.memory_space<any>>) target(%71 : memref<1x128xf32, #tpu.memory_space<vmem>>) target_semaphore(%73 : memref<!tpu.dma_semaphore, #tpu.memory_space<semaphore_mem>>)
      %c3_i32 = arith.constant 3 : i32
      %74 = arith.addi %49, %c3_i32 : i32
      %75 = arith.index_cast %74 : i32 to index
      %76 = memref.load %arg2[%75] : memref<16xi32, #tpu.memory_space<smem>>
      %c0_i32_38 = arith.constant 0 : i32
      %c0_i32_39 = arith.constant 0 : i32
      %c0_i32_40 = arith.constant 0 : i32
      %77 = tpu.memref_slice %arg3[%76, %c0_i32_40] : memref<64x128xf32, #tpu.memory_space<any>> -> memref<1x128xf32, #tpu.memory_space<any>>
      %c0_i32_41 = arith.constant 0 : i32
      %78 = tpu.memref_slice %arg8[%c0_i32_38, %c3_i32, %c0_i32_41] : memref<2x8x128xf32, #tpu.memory_space<vmem>> -> memref<1x1x128xf32, #tpu.memory_space<vmem>>
      %79 = tpu.memref_squeeze %78 : memref<1x1x128xf32, #tpu.memory_space<vmem>> -> memref<1x128xf32, #tpu.memory_space<vmem>>
      %80 = tpu.memref_slice %arg9[%c0_i32_39] : memref<2x!tpu.dma_semaphore, #tpu.memory_space<semaphore_mem>> -> memref<1x!tpu.dma_semaphore, #tpu.memory_space<semaphore_mem>>
      %81 = tpu.memref_squeeze %80 : memref<1x!tpu.dma_semaphore, #tpu.memory_space<semaphore_mem>> -> memref<!tpu.dma_semaphore, #tpu.memory_space<semaphore_mem>>
      tpu.enqueue_dma source(%77 : memref<1x128xf32, #tpu.memory_space<any>>) target(%79 : memref<1x128xf32, #tpu.memory_space<vmem>>) target_semaphore(%81 : memref<!tpu.dma_semaphore, #tpu.memory_space<semaphore_mem>>)
      %c4_i32 = arith.constant 4 : i32
      %82 = arith.addi %49, %c4_i32 : i32
      %83 = arith.index_cast %82 : i32 to index
      %84 = memref.load %arg2[%83] : memref<16xi32, #tpu.memory_space<smem>>
      %c0_i32_42 = arith.constant 0 : i32
      %c0_i32_43 = arith.constant 0 : i32
      %c0_i32_44 = arith.constant 0 : i32
      %85 = tpu.memref_slice %arg3[%84, %c0_i32_44] : memref<64x128xf32, #tpu.memory_space<any>> -> memref<1x128xf32, #tpu.memory_space<any>>
      %c0_i32_45 = arith.constant 0 : i32
      %86 = tpu.memref_slice %arg8[%c0_i32_42, %c4_i32, %c0_i32_45] : memref<2x8x128xf32, #tpu.memory_space<vmem>> -> memref<1x1x128xf32, #tpu.memory_space<vmem>>
      %87 = tpu.memref_squeeze %86 : memref<1x1x128xf32, #tpu.memory_space<vmem>> -> memref<1x128xf32, #tpu.memory_space<vmem>>
      %88 = tpu.memref_slice %arg9[%c0_i32_43] : memref<2x!tpu.dma_semaphore, #tpu.memory_space<semaphore_mem>> -> memref<1x!tpu.dma_semaphore, #tpu.memory_space<semaphore_mem>>
      %89 = tpu.memref_squeeze %88 : memref<1x!tpu.dma_semaphore, #tpu.memory_space<semaphore_mem>> -> memref<!tpu.dma_semaphore, #tpu.memory_space<semaphore_mem>>
      tpu.enqueue_dma source(%85 : memref<1x128xf32, #tpu.memory_space<any>>) target(%87 : memref<1x128xf32, #tpu.memory_space<vmem>>) target_semaphore(%89 : memref<!tpu.dma_semaphore, #tpu.memory_space<semaphore_mem>>)
      %c5_i32 = arith.constant 5 : i32
      %90 = arith.addi %49, %c5_i32 : i32
      %91 = arith.index_cast %90 : i32 to index
      %92 = memref.load %arg2[%91] : memref<16xi32, #tpu.memory_space<smem>>
      %c0_i32_46 = arith.constant 0 : i32
      %c0_i32_47 = arith.constant 0 : i32
      %c0_i32_48 = arith.constant 0 : i32
      %93 = tpu.memref_slice %arg3[%92, %c0_i32_48] : memref<64x128xf32, #tpu.memory_space<any>> -> memref<1x128xf32, #tpu.memory_space<any>>
      %c0_i32_49 = arith.constant 0 : i32
      %94 = tpu.memref_slice %arg8[%c0_i32_46, %c5_i32, %c0_i32_49] : memref<2x8x128xf32, #tpu.memory_space<vmem>> -> memref<1x1x128xf32, #tpu.memory_space<vmem>>
      %95 = tpu.memref_squeeze %94 : memref<1x1x128xf32, #tpu.memory_space<vmem>> -> memref<1x128xf32, #tpu.memory_space<vmem>>
      %96 = tpu.memref_slice %arg9[%c0_i32_47] : memref<2x!tpu.dma_semaphore, #tpu.memory_space<semaphore_mem>> -> memref<1x!tpu.dma_semaphore, #tpu.memory_space<semaphore_mem>>
      %97 = tpu.memref_squeeze %96 : memref<1x!tpu.dma_semaphore, #tpu.memory_space<semaphore_mem>> -> memref<!tpu.dma_semaphore, #tpu.memory_space<semaphore_mem>>
      tpu.enqueue_dma source(%93 : memref<1x128xf32, #tpu.memory_space<any>>) target(%95 : memref<1x128xf32, #tpu.memory_space<vmem>>) target_semaphore(%97 : memref<!tpu.dma_semaphore, #tpu.memory_space<semaphore_mem>>)
      %c6_i32 = arith.constant 6 : i32
      %98 = arith.addi %49, %c6_i32 : i32
      %99 = arith.index_cast %98 : i32 to index
      %100 = memref.load %arg2[%99] : memref<16xi32, #tpu.memory_space<smem>>
      %c0_i32_50 = arith.constant 0 : i32
      %c0_i32_51 = arith.constant 0 : i32
      %c0_i32_52 = arith.constant 0 : i32
      %101 = tpu.memref_slice %arg3[%100, %c0_i32_52] : memref<64x128xf32, #tpu.memory_space<any>> -> memref<1x128xf32, #tpu.memory_space<any>>
      %c0_i32_53 = arith.constant 0 : i32
      %102 = tpu.memref_slice %arg8[%c0_i32_50, %c6_i32, %c0_i32_53] : memref<2x8x128xf32, #tpu.memory_space<vmem>> -> memref<1x1x128xf32, #tpu.memory_space<vmem>>
      %103 = tpu.memref_squeeze %102 : memref<1x1x128xf32, #tpu.memory_space<vmem>> -> memref<1x128xf32, #tpu.memory_space<vmem>>
      %104 = tpu.memref_slice %arg9[%c0_i32_51] : memref<2x!tpu.dma_semaphore, #tpu.memory_space<semaphore_mem>> -> memref<1x!tpu.dma_semaphore, #tpu.memory_space<semaphore_mem>>
      %105 = tpu.memref_squeeze %104 : memref<1x!tpu.dma_semaphore, #tpu.memory_space<semaphore_mem>> -> memref<!tpu.dma_semaphore, #tpu.memory_space<semaphore_mem>>
      tpu.enqueue_dma source(%101 : memref<1x128xf32, #tpu.memory_space<any>>) target(%103 : memref<1x128xf32, #tpu.memory_space<vmem>>) target_semaphore(%105 : memref<!tpu.dma_semaphore, #tpu.memory_space<semaphore_mem>>)
      %c7_i32 = arith.constant 7 : i32
      %106 = arith.addi %49, %c7_i32 : i32
      %107 = arith.index_cast %106 : i32 to index
      %108 = memref.load %arg2[%107] : memref<16xi32, #tpu.memory_space<smem>>
      %c0_i32_54 = arith.constant 0 : i32
      %c0_i32_55 = arith.constant 0 : i32
      %c0_i32_56 = arith.constant 0 : i32
      %109 = tpu.memref_slice %arg3[%108, %c0_i32_56] : memref<64x128xf32, #tpu.memory_space<any>> -> memref<1x128xf32, #tpu.memory_space<any>>
      %c0_i32_57 = arith.constant 0 : i32
      %110 = tpu.memref_slice %arg8[%c0_i32_54, %c7_i32, %c0_i32_57] : memref<2x8x128xf32, #tpu.memory_space<vmem>> -> memref<1x1x128xf32, #tpu.memory_space<vmem>>
      %111 = tpu.memref_squeeze %110 : memref<1x1x128xf32, #tpu.memory_space<vmem>> -> memref<1x128xf32, #tpu.memory_space<vmem>>
      %112 = tpu.memref_slice %arg9[%c0_i32_55] : memref<2x!tpu.dma_semaphore, #tpu.memory_space<semaphore_mem>> -> memref<1x!tpu.dma_semaphore, #tpu.memory_space<semaphore_mem>>
      %113 = tpu.memref_squeeze %112 : memref<1x!tpu.dma_semaphore, #tpu.memory_space<semaphore_mem>> -> memref<!tpu.dma_semaphore, #tpu.memory_space<semaphore_mem>>
      tpu.enqueue_dma source(%109 : memref<1x128xf32, #tpu.memory_space<any>>) target(%111 : memref<1x128xf32, #tpu.memory_space<vmem>>) target_semaphore(%113 : memref<!tpu.dma_semaphore, #tpu.memory_space<semaphore_mem>>)
      %c8_i32_58 = arith.constant 8 : i32
    } else {
    }
    %c1_i32 = arith.constant 1 : i32
    %4 = arith.addi %arg1, %c1_i32 : i32
    %c1_i32_1 = arith.constant 1 : i32
    %5 = arith.cmpi slt, %4, %c1_i32_1 : i32
    %6 = arith.extui %5 : i1 to i32
    %c0_i32_2 = arith.constant 0 : i32
    %7 = arith.cmpi ne, %6, %c0_i32_2 : i32
    scf.if %7 {
      %c1_i32_20 = arith.constant 1 : i32
      %47 = arith.addi %arg1, %c1_i32_20 : i32
      %c1_i32_21 = arith.constant 1 : i32
      %48 = arith.subi %c1_i32_21, %0 : i32
      %c1_i32_22 = arith.constant 1 : i32
      %49 = arith.muli %arg0, %c1_i32_22 : i32
      %50 = arith.addi %49, %47 : i32
      %c8_i32_23 = arith.constant 8 : i32
      %51 = arith.muli %50, %c8_i32_23 : i32
      %c0_i32_24 = arith.constant 0 : i32
      %52 = arith.addi %51, %c0_i32_24 : i32
      %53 = arith.index_cast %52 : i32 to index
      %54 = memref.load %arg2[%53] : memref<16xi32, #tpu.memory_space<smem>>
      %c0_i32_25 = arith.constant 0 : i32
      %55 = tpu.memref_slice %arg3[%54, %c0_i32_25] : memref<64x128xf32, #tpu.memory_space<any>> -> memref<1x128xf32, #tpu.memory_space<any>>
      %c0_i32_26 = arith.constant 0 : i32
      %56 = tpu.memref_slice %arg8[%48, %c0_i32_24, %c0_i32_26] : memref<2x8x128xf32, #tpu.memory_space<vmem>> -> memref<1x1x128xf32, #tpu.memory_space<vmem>>
      %57 = tpu.memref_squeeze %56 : memref<1x1x128xf32, #tpu.memory_space<vmem>> -> memref<1x128xf32, #tpu.memory_space<vmem>>
      %58 = tpu.memref_slice %arg9[%48] : memref<2x!tpu.dma_semaphore, #tpu.memory_space<semaphore_mem>> -> memref<1x!tpu.dma_semaphore, #tpu.memory_space<semaphore_mem>>
      %59 = tpu.memref_squeeze %58 : memref<1x!tpu.dma_semaphore, #tpu.memory_space<semaphore_mem>> -> memref<!tpu.dma_semaphore, #tpu.memory_space<semaphore_mem>>
      tpu.enqueue_dma source(%55 : memref<1x128xf32, #tpu.memory_space<any>>) target(%57 : memref<1x128xf32, #tpu.memory_space<vmem>>) target_semaphore(%59 : memref<!tpu.dma_semaphore, #tpu.memory_space<semaphore_mem>>)
      %c1_i32_27 = arith.constant 1 : i32
      %60 = arith.addi %51, %c1_i32_27 : i32
      %61 = arith.index_cast %60 : i32 to index
      %62 = memref.load %arg2[%61] : memref<16xi32, #tpu.memory_space<smem>>
      %c0_i32_28 = arith.constant 0 : i32
      %63 = tpu.memref_slice %arg3[%62, %c0_i32_28] : memref<64x128xf32, #tpu.memory_space<any>> -> memref<1x128xf32, #tpu.memory_space<any>>
      %c0_i32_29 = arith.constant 0 : i32
      %64 = tpu.memref_slice %arg8[%48, %c1_i32_27, %c0_i32_29] : memref<2x8x128xf32, #tpu.memory_space<vmem>> -> memref<1x1x128xf32, #tpu.memory_space<vmem>>
      %65 = tpu.memref_squeeze %64 : memref<1x1x128xf32, #tpu.memory_space<vmem>> -> memref<1x128xf32, #tpu.memory_space<vmem>>
      %66 = tpu.memref_slice %arg9[%48] : memref<2x!tpu.dma_semaphore, #tpu.memory_space<semaphore_mem>> -> memref<1x!tpu.dma_semaphore, #tpu.memory_space<semaphore_mem>>
      %67 = tpu.memref_squeeze %66 : memref<1x!tpu.dma_semaphore, #tpu.memory_space<semaphore_mem>> -> memref<!tpu.dma_semaphore, #tpu.memory_space<semaphore_mem>>
      tpu.enqueue_dma source(%63 : memref<1x128xf32, #tpu.memory_space<any>>) target(%65 : memref<1x128xf32, #tpu.memory_space<vmem>>) target_semaphore(%67 : memref<!tpu.dma_semaphore, #tpu.memory_space<semaphore_mem>>)
      %c2_i32_30 = arith.constant 2 : i32
      %68 = arith.addi %51, %c2_i32_30 : i32
      %69 = arith.index_cast %68 : i32 to index
      %70 = memref.load %arg2[%69] : memref<16xi32, #tpu.memory_space<smem>>
      %c0_i32_31 = arith.constant 0 : i32
      %71 = tpu.memref_slice %arg3[%70, %c0_i32_31] : memref<64x128xf32, #tpu.memory_space<any>> -> memref<1x128xf32, #tpu.memory_space<any>>
      %c0_i32_32 = arith.constant 0 : i32
      %72 = tpu.memref_slice %arg8[%48, %c2_i32_30, %c0_i32_32] : memref<2x8x128xf32, #tpu.memory_space<vmem>> -> memref<1x1x128xf32, #tpu.memory_space<vmem>>
      %73 = tpu.memref_squeeze %72 : memref<1x1x128xf32, #tpu.memory_space<vmem>> -> memref<1x128xf32, #tpu.memory_space<vmem>>
      %74 = tpu.memref_slice %arg9[%48] : memref<2x!tpu.dma_semaphore, #tpu.memory_space<semaphore_mem>> -> memref<1x!tpu.dma_semaphore, #tpu.memory_space<semaphore_mem>>
      %75 = tpu.memref_squeeze %74 : memref<1x!tpu.dma_semaphore, #tpu.memory_space<semaphore_mem>> -> memref<!tpu.dma_semaphore, #tpu.memory_space<semaphore_mem>>
      tpu.enqueue_dma source(%71 : memref<1x128xf32, #tpu.memory_space<any>>) target(%73 : memref<1x128xf32, #tpu.memory_space<vmem>>) target_semaphore(%75 : memref<!tpu.dma_semaphore, #tpu.memory_space<semaphore_mem>>)
      %c3_i32 = arith.constant 3 : i32
      %76 = arith.addi %51, %c3_i32 : i32
      %77 = arith.index_cast %76 : i32 to index
      %78 = memref.load %arg2[%77] : memref<16xi32, #tpu.memory_space<smem>>
      %c0_i32_33 = arith.constant 0 : i32
      %79 = tpu.memref_slice %arg3[%78, %c0_i32_33] : memref<64x128xf32, #tpu.memory_space<any>> -> memref<1x128xf32, #tpu.memory_space<any>>
      %c0_i32_34 = arith.constant 0 : i32
      %80 = tpu.memref_slice %arg8[%48, %c3_i32, %c0_i32_34] : memref<2x8x128xf32, #tpu.memory_space<vmem>> -> memref<1x1x128xf32, #tpu.memory_space<vmem>>
      %81 = tpu.memref_squeeze %80 : memref<1x1x128xf32, #tpu.memory_space<vmem>> -> memref<1x128xf32, #tpu.memory_space<vmem>>
      %82 = tpu.memref_slice %arg9[%48] : memref<2x!tpu.dma_semaphore, #tpu.memory_space<semaphore_mem>> -> memref<1x!tpu.dma_semaphore, #tpu.memory_space<semaphore_mem>>
      %83 = tpu.memref_squeeze %82 : memref<1x!tpu.dma_semaphore, #tpu.memory_space<semaphore_mem>> -> memref<!tpu.dma_semaphore, #tpu.memory_space<semaphore_mem>>
      tpu.enqueue_dma source(%79 : memref<1x128xf32, #tpu.memory_space<any>>) target(%81 : memref<1x128xf32, #tpu.memory_space<vmem>>) target_semaphore(%83 : memref<!tpu.dma_semaphore, #tpu.memory_space<semaphore_mem>>)
      %c4_i32 = arith.constant 4 : i32
      %84 = arith.addi %51, %c4_i32 : i32
      %85 = arith.index_cast %84 : i32 to index
      %86 = memref.load %arg2[%85] : memref<16xi32, #tpu.memory_space<smem>>
      %c0_i32_35 = arith.constant 0 : i32
      %87 = tpu.memref_slice %arg3[%86, %c0_i32_35] : memref<64x128xf32, #tpu.memory_space<any>> -> memref<1x128xf32, #tpu.memory_space<any>>
      %c0_i32_36 = arith.constant 0 : i32
      %88 = tpu.memref_slice %arg8[%48, %c4_i32, %c0_i32_36] : memref<2x8x128xf32, #tpu.memory_space<vmem>> -> memref<1x1x128xf32, #tpu.memory_space<vmem>>
      %89 = tpu.memref_squeeze %88 : memref<1x1x128xf32, #tpu.memory_space<vmem>> -> memref<1x128xf32, #tpu.memory_space<vmem>>
      %90 = tpu.memref_slice %arg9[%48] : memref<2x!tpu.dma_semaphore, #tpu.memory_space<semaphore_mem>> -> memref<1x!tpu.dma_semaphore, #tpu.memory_space<semaphore_mem>>
      %91 = tpu.memref_squeeze %90 : memref<1x!tpu.dma_semaphore, #tpu.memory_space<semaphore_mem>> -> memref<!tpu.dma_semaphore, #tpu.memory_space<semaphore_mem>>
      tpu.enqueue_dma source(%87 : memref<1x128xf32, #tpu.memory_space<any>>) target(%89 : memref<1x128xf32, #tpu.memory_space<vmem>>) target_semaphore(%91 : memref<!tpu.dma_semaphore, #tpu.memory_space<semaphore_mem>>)
      %c5_i32 = arith.constant 5 : i32
      %92 = arith.addi %51, %c5_i32 : i32
      %93 = arith.index_cast %92 : i32 to index
      %94 = memref.load %arg2[%93] : memref<16xi32, #tpu.memory_space<smem>>
      %c0_i32_37 = arith.constant 0 : i32
      %95 = tpu.memref_slice %arg3[%94, %c0_i32_37] : memref<64x128xf32, #tpu.memory_space<any>> -> memref<1x128xf32, #tpu.memory_space<any>>
      %c0_i32_38 = arith.constant 0 : i32
      %96 = tpu.memref_slice %arg8[%48, %c5_i32, %c0_i32_38] : memref<2x8x128xf32, #tpu.memory_space<vmem>> -> memref<1x1x128xf32, #tpu.memory_space<vmem>>
      %97 = tpu.memref_squeeze %96 : memref<1x1x128xf32, #tpu.memory_space<vmem>> -> memref<1x128xf32, #tpu.memory_space<vmem>>
      %98 = tpu.memref_slice %arg9[%48] : memref<2x!tpu.dma_semaphore, #tpu.memory_space<semaphore_mem>> -> memref<1x!tpu.dma_semaphore, #tpu.memory_space<semaphore_mem>>
      %99 = tpu.memref_squeeze %98 : memref<1x!tpu.dma_semaphore, #tpu.memory_space<semaphore_mem>> -> memref<!tpu.dma_semaphore, #tpu.memory_space<semaphore_mem>>
      tpu.enqueue_dma source(%95 : memref<1x128xf32, #tpu.memory_space<any>>) target(%97 : memref<1x128xf32, #tpu.memory_space<vmem>>) target_semaphore(%99 : memref<!tpu.dma_semaphore, #tpu.memory_space<semaphore_mem>>)
      %c6_i32 = arith.constant 6 : i32
      %100 = arith.addi %51, %c6_i32 : i32
      %101 = arith.index_cast %100 : i32 to index
      %102 = memref.load %arg2[%101] : memref<16xi32, #tpu.memory_space<smem>>
      %c0_i32_39 = arith.constant 0 : i32
      %103 = tpu.memref_slice %arg3[%102, %c0_i32_39] : memref<64x128xf32, #tpu.memory_space<any>> -> memref<1x128xf32, #tpu.memory_space<any>>
      %c0_i32_40 = arith.constant 0 : i32
      %104 = tpu.memref_slice %arg8[%48, %c6_i32, %c0_i32_40] : memref<2x8x128xf32, #tpu.memory_space<vmem>> -> memref<1x1x128xf32, #tpu.memory_space<vmem>>
      %105 = tpu.memref_squeeze %104 : memref<1x1x128xf32, #tpu.memory_space<vmem>> -> memref<1x128xf32, #tpu.memory_space<vmem>>
      %106 = tpu.memref_slice %arg9[%48] : memref<2x!tpu.dma_semaphore, #tpu.memory_space<semaphore_mem>> -> memref<1x!tpu.dma_semaphore, #tpu.memory_space<semaphore_mem>>
      %107 = tpu.memref_squeeze %106 : memref<1x!tpu.dma_semaphore, #tpu.memory_space<semaphore_mem>> -> memref<!tpu.dma_semaphore, #tpu.memory_space<semaphore_mem>>
      tpu.enqueue_dma source(%103 : memref<1x128xf32, #tpu.memory_space<any>>) target(%105 : memref<1x128xf32, #tpu.memory_space<vmem>>) target_semaphore(%107 : memref<!tpu.dma_semaphore, #tpu.memory_space<semaphore_mem>>)
      %c7_i32 = arith.constant 7 : i32
      %108 = arith.addi %51, %c7_i32 : i32
      %109 = arith.index_cast %108 : i32 to index
      %110 = memref.load %arg2[%109] : memref<16xi32, #tpu.memory_space<smem>>
      %c0_i32_41 = arith.constant 0 : i32
      %111 = tpu.memref_slice %arg3[%110, %c0_i32_41] : memref<64x128xf32, #tpu.memory_space<any>> -> memref<1x128xf32, #tpu.memory_space<any>>
      %c0_i32_42 = arith.constant 0 : i32
      %112 = tpu.memref_slice %arg8[%48, %c7_i32, %c0_i32_42] : memref<2x8x128xf32, #tpu.memory_space<vmem>> -> memref<1x1x128xf32, #tpu.memory_space<vmem>>
      %113 = tpu.memref_squeeze %112 : memref<1x1x128xf32, #tpu.memory_space<vmem>> -> memref<1x128xf32, #tpu.memory_space<vmem>>
      %114 = tpu.memref_slice %arg9[%48] : memref<2x!tpu.dma_semaphore, #tpu.memory_space<semaphore_mem>> -> memref<1x!tpu.dma_semaphore, #tpu.memory_space<semaphore_mem>>
      %115 = tpu.memref_squeeze %114 : memref<1x!tpu.dma_semaphore, #tpu.memory_space<semaphore_mem>> -> memref<!tpu.dma_semaphore, #tpu.memory_space<semaphore_mem>>
      tpu.enqueue_dma source(%111 : memref<1x128xf32, #tpu.memory_space<any>>) target(%113 : memref<1x128xf32, #tpu.memory_space<vmem>>) target_semaphore(%115 : memref<!tpu.dma_semaphore, #tpu.memory_space<semaphore_mem>>)
      %c8_i32_43 = arith.constant 8 : i32
    } else {
    }
    %c0_i32_3 = arith.constant 0 : i32
    %c0_i32_4 = arith.constant 0 : i32
    %8 = tpu.memref_slice %arg8[%0, %c0_i32_3, %c0_i32_4] : memref<2x8x128xf32, #tpu.memory_space<vmem>> -> memref<1x8x128xf32, #tpu.memory_space<vmem>>
    %9 = tpu.memref_squeeze %8 : memref<1x8x128xf32, #tpu.memory_space<vmem>> -> memref<8x128xf32, #tpu.memory_space<vmem>>
    %c0_i32_5 = arith.constant 0 : i32
    %c0_i32_6 = arith.constant 0 : i32
    %10 = tpu.memref_slice %arg8[%0, %c0_i32_5, %c0_i32_6] : memref<2x8x128xf32, #tpu.memory_space<vmem>> -> memref<1x8x128xf32, #tpu.memory_space<vmem>>
    %11 = tpu.memref_squeeze %10 : memref<1x8x128xf32, #tpu.memory_space<vmem>> -> memref<8x128xf32, #tpu.memory_space<vmem>>
    %12 = tpu.memref_slice %arg9[%0] : memref<2x!tpu.dma_semaphore, #tpu.memory_space<semaphore_mem>> -> memref<1x!tpu.dma_semaphore, #tpu.memory_space<semaphore_mem>>
    %13 = tpu.memref_squeeze %12 : memref<1x!tpu.dma_semaphore, #tpu.memory_space<semaphore_mem>> -> memref<!tpu.dma_semaphore, #tpu.memory_space<semaphore_mem>>
    tpu.wait_dma2 semaphore(%13 : memref<!tpu.dma_semaphore, #tpu.memory_space<semaphore_mem>>) src(%9 : memref<8x128xf32, #tpu.memory_space<vmem>>) dst(%11 : memref<8x128xf32, #tpu.memory_space<vmem>>)
    %c8_i32 = arith.constant 8 : i32
    %14 = arith.muli %arg1, %c8_i32 : i32
    %15 = tpu.assume_multiple %14, 8 : i32
    %16 = arith.index_cast %0 : i32 to index
    %c0 = arith.constant 0 : index
    %c0_7 = arith.constant 0 : index
    %17 = vector.load %arg8[%16, %c0, %c0_7] : memref<2x8x128xf32, #tpu.memory_space<vmem>>, vector<1x8x128xf32>
    %18 = vector.shape_cast %17 : vector<1x8x128xf32> to vector<8x128xf32>
    %19 = arith.index_cast %15 : i32 to index
    %c0_8 = arith.constant 0 : index
    %20 = vector.load %arg4[%19, %c0_8] : memref<8x128xf32, #tpu.memory_space<vmem>>, vector<8x128xf32>
    %21 = arith.addf %18, %20 : vector<8x128xf32>
    %cst = arith.constant dense<0.000000e+00> : vector<8xf32>
    %22 = vector.multi_reduction <add>, %21, %cst [1] : vector<8x128xf32> to vector<8xf32>
    %23 = vector.shape_cast %22 : vector<8xf32> to vector<8x1xf32>
    %cst_9 = arith.constant 1.280000e+02 : f32
    %24 = vector.broadcast %cst_9 : f32 to vector<8x1xf32>
    %25 = arith.divf %23, %24 : vector<8x1xf32>
    %26 = vector.broadcast %25 : vector<8x1xf32> to vector<8x128xf32>
    %27 = arith.subf %21, %26 : vector<8x128xf32>
    %28 = arith.mulf %27, %27 : vector<8x128xf32>
    %cst_10 = arith.constant dense<0.000000e+00> : vector<8xf32>
    %29 = vector.multi_reduction <add>, %28, %cst_10 [1] : vector<8x128xf32> to vector<8xf32>
    %30 = vector.shape_cast %29 : vector<8xf32> to vector<8x1xf32>
    %cst_11 = arith.constant 1.280000e+02 : f32
    %31 = vector.broadcast %cst_11 : f32 to vector<8x1xf32>
    %32 = arith.divf %30, %31 : vector<8x1xf32>
    %cst_12 = arith.constant 9.99999974E-6 : f32
    %33 = vector.broadcast %cst_12 : f32 to vector<8x1xf32>
    %34 = arith.addf %32, %33 : vector<8x1xf32>
    %35 = math.rsqrt %34 : vector<8x1xf32>
    %36 = vector.broadcast %35 : vector<8x1xf32> to vector<8x128xf32>
    %37 = arith.mulf %27, %36 : vector<8x128xf32>
    %c0_13 = arith.constant 0 : index
    %c0_14 = arith.constant 0 : index
    %38 = vector.load %arg5[%c0_13, %c0_14] : memref<1x128xf32, #tpu.memory_space<vmem>>, vector<1x128xf32>
    %39 = vector.broadcast %38 : vector<1x128xf32> to vector<8x128xf32>
    %40 = arith.mulf %37, %39 : vector<8x128xf32>
    %c0_15 = arith.constant 0 : index
    %c0_16 = arith.constant 0 : index
    %41 = vector.load %arg6[%c0_15, %c0_16] : memref<1x128xf32, #tpu.memory_space<vmem>>, vector<1x128xf32>
    %42 = vector.broadcast %41 : vector<1x128xf32> to vector<8x128xf32>
    %43 = arith.addf %40, %42 : vector<8x128xf32>
    %c0_17 = arith.constant 0 : index
    %c0_18 = arith.constant 0 : index
    %c0_19 = arith.constant 0 : index
    %44 = vector.load %arg7[%c0_17, %c0_18, %c0_19] : memref<1x8x128xf32, #tpu.memory_space<vmem>>, vector<1x8x128xf32>
    %45 = vector.shape_cast %44 : vector<1x8x128xf32> to vector<8x128xf32>
    %46 = vector.shape_cast %43 : vector<8x128xf32> to vector<1x8x128xf32>
    tpu.vector_store %arg7[%c0_17, %c0_18, %c0_19], %46 {strides = array<i32>} : memref<1x8x128xf32, #tpu.memory_space<vmem>>, vector<1x8x128xf32>,
    return
  }
  func.func @transform_1(%arg0: i32, %arg1: i32, %arg2: memref<16xi32, #tpu.memory_space<smem>>) -> (i32, i32) {
    %c0_i32 = arith.constant 0 : i32
    %c0_i32_0 = arith.constant 0 : i32
    %c0_i32_1 = arith.constant 0 : i32
    return %c0_i32, %c0_i32_0 : i32, i32
  }
  func.func @transform_2(%arg0: i32, %arg1: i32, %arg2: memref<16xi32, #tpu.memory_space<smem>>) -> (i32, i32) {
    %c0_i32 = arith.constant 0 : i32
    %c0_i32_0 = arith.constant 0 : i32
    %c0_i32_1 = arith.constant 0 : i32
    return %c0_i32, %c0_i32_0 : i32, i32
  }
  func.func @transform_3(%arg0: i32, %arg1: i32, %arg2: memref<16xi32, #tpu.memory_space<smem>>) -> (i32, i32) {
    %c0_i32 = arith.constant 0 : i32
    %c0_i32_0 = arith.constant 0 : i32
    %c0_i32_1 = arith.constant 0 : i32
    return %c0_i32, %c0_i32_0 : i32, i32
  }
  func.func @transform_4(%arg0: i32, %arg1: i32, %arg2: memref<16xi32, #tpu.memory_space<smem>>) -> (i32, i32, i32) {
    %c0_i32 = arith.constant 0 : i32
    %c0_i32_0 = arith.constant 0 : i32
    return %arg0, %arg1, %c0_i32 : i32, i32, i32
  }
}

</mosaic_0001>

<bundles_post_ra>
// kernel: tpu_custom_call.1
= control target key start
LH: loop header
LB: loop body
LE: loop exit
PB: predicated region body
PF: predicated region fallthrough
CT: control target
= control target key end

     0   :  { %s1075_s18 = smov [#allocation5]   ;;  %s1371_s0 = inlined_call_operand.hbm [shape: s32[16], index: 0, kind: input, shape index: {}]   ;;  %s1372_s1 = inlined_call_operand.hbm [shape: f32[64,128], index: 1, kind: input, shape index: {}]   ;;  %s1373_s2 = inlined_call_operand.hbm [shape: f32[8,128], index: 2, kind: input, shape index: {}]   ;;  %s1374_s3 = inlined_call_operand.vmem [shape: f32[1,128], index: 3, kind: input, shape index: {}]   ;;  %s1375_s4 = inlined_call_operand.vmem [shape: f32[1,128], index: 4, kind: input, shape index: {}]   ;;  %s1376_s5 = inlined_call_operand.hbm [shape: f32[2,8,128], index: 5, kind: output, shape index: {}]  }
   0x1   :  { %1381 = sst [smem:[#allocation52_spill]] %s1373_s2 }
   0x2   :  { %11 = dma.hbm_to_smem %s1371_s0, 16, %s1075_s18, [#allocation4] }
   0x3   :  { %1039 = dma.done.wait [#allocation4], 16 }
   0x4   :  { %1040 = vsyncadd [#allocation4], 4294967280 }
   0x5   :  { %13 = sfence }
   0x6   :  { %14 = vsyncpa [#allocation7], 0 }
   0x7   :  { %15 = vsyncpa [#allocation8], 0 }
   0x8   :  { %17 = vsyncpa [#allocation8 + $0x1], 0  ;;  %s1119_s21 = smov 0   ;;  %s1121_s22 = smov 0  }
   0x9   :  { %s1123_s23 = smov 0   ;;  %s1125_s24 = smov 0  }
   0xa   :  { %s1127_s25 = smov 0   ;;  %s1129_s26 = smov 0  }
   0xb LB: > { %1382 = sst [smem:[#allocation48_spill]] %s1061_s23  ;;  %s660_s0 = sadd.s32 4294967295, %s1073_s26   ;;  %s1073_s26 = sphi %s1129_s26, %s23_s26   ;;  %s1069_s25 = sphi %s1127_s25, %s1395_s25   ;;  %s1065_s24 = sphi %s1125_s24, %s1394_s24   ;;  %s1061_s23 = sphi %s1123_s23, %s1393_s23   ;;  %s1057_s22 = sphi %s1121_s22, %s1397_s22   ;;  %s1053_s21 = sphi %s1119_s21, %s1396_s21  }
   0xc   : > { %1383 = sst [smem:[#allocation49_spill]] %s1069_s25  ;;  %s661_s27 = sadd.s32 4294967294, %s1073_s26  }
   0xd   : > { %s35_s28 = sadd.s32 1, %s1069_s25  ;;  %s107_s29 = sadd.s32 1, %s1061_s23 }
   0xe   : > { %p37_p0 = scmp.ge.s32.totalorder %s35_s28, 2  ;;  %p117_p1 = scmp.ne.s32.totalorder %s1061_s23, %s1057_s22 }
   0xf   : > { %p118_p2 = scmp.eq.s32.totalorder %s660_s0, 1  ;;  %p123_p3 = scmp.ne.s32.totalorder %s1057_s22, %s1053_s21 }
  0x10   : > { %s1399_s28 = smov (%p37_p0, %s35_s28), 0  ;;  %p124_p5 = scmp.eq.s32.totalorder %s661_s27, 1 }
  0x11   : > { %1384 = sst [smem:[#allocation50_spill]] %s1399_s28  ;;  %p1159_p4 = por %p118_p2, %p117_p1 }
  0x12   : > { %s102_s6 = ssub.s32 %s1069_s25, %s1399_s28  ;;  %p662_p6 = scmp.ge.s32.totalorder %s1073_s26, 1 }
  0x13   : > { %p105_p7 = scmp.eq.s32.totalorder %s102_s6, 0  ;;  %p1166_p8 = por %p124_p5, %p123_p3 }
  0x14   : > { %p131_p9 = scmp.lt.s32.totalorder %s1073_s26, 3  ;;  %p1178_p11 = scmp.eq.s32.totalorder %s660_s0, 0 }
  0x15   : > { %s1172_s8 = scalar_select %p105_p7, %s1061_s23, %s107_s29  }
  0x16   : > { %p1174_p10 = pnand %p662_p6, %p131_p9  ;;  %s1076_s11 = smov [#allocation6]  }
  0x17   : > { %1387 = sst [smem:[#allocation51_spill]] %s1172_s8  ;;  %s144_s12 = sshll.u32 %s1076_s11, 4  ;;  %s145_s12 = int_to_ptr.vmem [resolvable:$true] %s144_s12 }
  0x18   : > { %p708_p12 = pneg %p1174_p10  ;;  %s798_s13 = scalar_lea.vmem %s145_s12, 128 }
  0x19   : > { %p799_p1 = scmp.ne.s32.totalorder %s145_s12, %s798_s13  ;;  %p806_p5 = scmp.lt.s32.totalorder %s145_s12, %s145_s12 }
  0x1a   : > { %p709_p13 = pnand %p1178_p11, %p708_p12  ;;  %p807_p6 = scmp.lt.s32.totalorder %s798_s13, %s798_s13 }
  0x1c   : > { %p789_p0 = pneg %p709_p13  ;;  %p808_p7 = por %p807_p6, %p806_p5 }
  0x1e   : > { %p801_p2 = pnand %p799_p1, %p789_p0 }
  0x20   : > { %p802_p3 = pneg %p801_p2 }
  0x22   : > { %p809_p9 = pnand %p808_p7, %p802_p3 }
  0x24   : > { %812 = shalt.err (!%p809_p9)
}
  0x25   : > { %s1390_s2 = sld [smem:[#allocation52_spill]] }
  0x27   : > { %163 = sbr.rel (%p1174_p10) target bundleno = 534 (0x216), region = 32 }
  0x2b   : > { %711 = dma.hbm_to_vmem [thread:$0]  (!%p709_p13), %s1390_s2, 128, %s145_s12, [#allocation7]  }
  0x2c   : > { %1042 = dma.done.wait (%p1178_p11), [#allocation7], 128  }
  0x2d   : > { %1044 = vsyncadd (%p1178_p11), [#allocation7], 4294967168  ;;  %s1377_s16 = sand.u32 1, %s1057_s22   ;;  %s1197_s17 = sshll.u32 %s1065_s24, 3 }
  0x2e   : > { %s1201_s18 = sshll.u32 %s1377_s16, 3  ;;  %s193_s19 = sld [smem:[#allocation5 + %s1197_s17]] }
  0x2f   : > { %s1077_s20 = smov [#allocation2]   ;;  %s207_s27 = sadd.s32 1, %s1197_s17 }
  0x30   : > { %s203_s0 = sshll.u32 %s1077_s20, 4  ;;  %s1207_s29 = sld [smem:[#allocation5 + %s207_s27]]  ;;  %s1205_s0 = int_to_ptr.vmem [resolvable:$true] %s203_s0 }
  0x31   : > { %s223_s6 = sadd.s32 2, %s1197_s17  ;;  %s1078_s9 = smov [#allocation2 + $0x1]  }
  0x32   : > { %s219_s10 = sshll.u32 %s1078_s9, 4  ;;  %s1210_s11 = sld [smem:[#allocation5 + %s223_s6]]  ;;  %s1212_s10 = int_to_ptr.vmem [resolvable:$true] %s219_s10 }
  0x33   : > { %s1220_s28 = scalar_lea.hbm %s1372_s1, 1024 }
  0x34   : > { %s668_s12 = sshll.u32 %s193_s19, 4 }
  0x35   : > { %s195_s15 = scalar_lea.hbm %s1372_s1, %s668_s12 }
  0x36   : > { %s813_s16 = scalar_lea.hbm %s195_s15, 16  ;;  %p816_p11 = scmp.lt.s32.totalorder %s195_s15, %s1372_s1 }
  0x37   : > { %p814_p10 = scmp.ne.s32.totalorder %s195_s15, %s813_s16  ;;  %p817_p12 = scmp.lt.s32.totalorder %s1220_s28, %s813_s16 }
  0x39   : > { %p818_p13 = por %p817_p12, %p816_p11 }
  0x3b   : > { %p819_p0 = pnand %p818_p13, %p814_p10 }
  0x3d   : > { %822 = shalt.err (!%p819_p0)  }
  0x3e   : > { %s823_s19 = scalar_lea.vmem %s1205_s0, 16  ;;  %s1229_s6 = scalar_lea.vmem %s1205_s0, 256 }
  0x3f   : > { %p824_p1 = scmp.ne.s32.totalorder %s1205_s0, %s823_s19  ;;  %p828_p2 = scmp.lt.s32.totalorder %s1205_s0, %s1205_s0 }
  0x40   : > { %p829_p3 = scmp.lt.s32.totalorder %s1229_s6, %s823_s19 }
  0x42   : > { %p830_p5 = por %p829_p3, %p828_p2 }
  0x44   : > { %p831_p6 = pnand %p830_p5, %p824_p1 }
  0x46   : > { %834 = shalt.err (!%p831_p6)  }
  0x47   : > { %206 = dma.hbm_to_vmem [thread:$0]  %s195_s15, 16, %s1205_s0, [#allocation3] }
  0x48   : > { %s669_s2 = sshll.u32 %s1207_s29, 4  ;;  %s1079_s25 = smov [#allocation2 + $0x2]  }
  0x49   : > { %s235_s16 = sshll.u32 %s1079_s25, 4  ;;  %s210_s13 = scalar_lea.hbm %s1372_s1, %s669_s2  ;;  %s1239_s16 = int_to_ptr.vmem [resolvable:$true] %s235_s16 }
  0x4a   : > { %s835_s14 = scalar_lea.hbm %s210_s13, 16  ;;  %p838_p9 = scmp.lt.s32.totalorder %s210_s13, %s1372_s1 }
  0x4b   : > { %p836_p7 = scmp.ne.s32.totalorder %s210_s13, %s835_s14  ;;  %p839_p10 = scmp.lt.s32.totalorder %s1220_s28, %s835_s14 }
  0x4d   : > { %p840_p11 = por %p839_p10, %p838_p9 }
  0x4f   : > { %p841_p12 = pnand %p840_p11, %p836_p7 }
  0x51   : > { %844 = shalt.err (!%p841_p12)  }
  0x52   : > { %s845_s29 = scalar_lea.vmem %s1212_s10, 16  ;;  %p850_p0 = scmp.lt.s32.totalorder %s1212_s10, %s1205_s0 }
  0x53   : > { %p846_p13 = scmp.ne.s32.totalorder %s1212_s10, %s845_s29  ;;  %p851_p1 = scmp.lt.s32.totalorder %s1229_s6, %s845_s29 }
  0x55   : > { %p852_p2 = por %p851_p1, %p850_p0 }
  0x57   : > { %p853_p3 = pnand %p852_p2, %p846_p13 }
  0x59   : > { %856 = shalt.err (!%p853_p3)  }
  0x5a   : > { %222 = dma.hbm_to_vmem [thread:$0]  %s210_s13, 16, %s1212_s10, [#allocation3] }
  0x5b   : > { %s670_s15 = sshll.u32 %s1210_s11, 4  ;;  %s239_s19 = sadd.s32 3, %s1197_s17 }
  0x5c   : > { %s226_s9 = scalar_lea.hbm %s1372_s1, %s670_s15  ;;  %s240_s12 = sld [smem:[#allocation5 + %s239_s19]] }
  0x5d   : > { %s857_s14 = scalar_lea.hbm %s226_s9, 16  ;;  %p860_p6 = scmp.lt.s32.totalorder %s226_s9, %s1372_s1 }
  0x5e   : > { %p858_p5 = scmp.ne.s32.totalorder %s226_s9, %s857_s14  ;;  %p861_p7 = scmp.lt.s32.totalorder %s1220_s28, %s857_s14 }
  0x60   : > { %p862_p9 = por %p861_p7, %p860_p6 }
  0x62   : > { %p863_p10 = pnand %p862_p9, %p858_p5 }
  0x64   : > { %866 = shalt.err (!%p863_p10)  }
  0x65   : > { %s867_s10 = scalar_lea.vmem %s1239_s16, 16  ;;  %p872_p12 = scmp.lt.s32.totalorder %s1239_s16, %s1205_s0 }
  0x66   : > { %p868_p11 = scmp.ne.s32.totalorder %s1239_s16, %s867_s10  ;;  %p873_p13 = scmp.lt.s32.totalorder %s1229_s6, %s867_s10 }
  0x68   : > { %p874_p0 = por %p873_p13, %p872_p12 }
  0x6a   : > { %p875_p1 = pnand %p874_p0, %p868_p11 }
  0x6c   : > { %878 = shalt.err (!%p875_p1)  }
  0x6d   : > { %238 = dma.hbm_to_vmem [thread:$0]  %s226_s9, 16, %s1239_s16, [#allocation3] }
  0x6e   : > { %s255_s11 = sadd.s32 4, %s1197_s17  ;;  %s1080_s13 = smov [#allocation2 + $0x3]  }
  0x6f   : > { %s251_s29 = sshll.u32 %s1080_s13, 4  ;;  %s256_s15 = sld [smem:[#allocation5 + %s255_s11]]  ;;  %s252_s29 = int_to_ptr.vmem [resolvable:$true] %s251_s29 }
  0x70   : > { %s1081_s19 = smov [#allocation2 + $0x4]   ;;  %s271_s25 = sadd.s32 5, %s1197_s17 }
  0x71   : > { %s267_s2 = sshll.u32 %s1081_s19, 4  ;;  %s671_s14 = sshll.u32 %s240_s12, 4  ;;  %s1268_s2 = int_to_ptr.vmem [resolvable:$true] %s267_s2 }
  0x72   : > { %s242_s10 = scalar_lea.hbm %s1372_s1, %s671_s14  ;;  %s1273_s8 = sld [smem:[#allocation5 + %s271_s25]] }
  0x73   : > { %s879_s23 = scalar_lea.hbm %s242_s10, 16  ;;  %p882_p3 = scmp.lt.s32.totalorder %s242_s10, %s1372_s1 }
  0x74   : > { %p880_p2 = scmp.ne.s32.totalorder %s242_s10, %s879_s23  ;;  %p883_p5 = scmp.lt.s32.totalorder %s1220_s28, %s879_s23 }
  0x76   : > { %p884_p6 = por %p883_p5, %p882_p3 }
  0x78   : > { %p885_p7 = pnand %p884_p6, %p880_p2 }
  0x7a   : > { %888 = shalt.err (!%p885_p7)  }
  0x7b   : > { %s889_s11 = scalar_lea.vmem %s252_s29, 16  ;;  %p894_p10 = scmp.lt.s32.totalorder %s252_s29, %s1205_s0 }
  0x7c   : > { %p890_p9 = scmp.ne.s32.totalorder %s252_s29, %s889_s11  ;;  %p895_p11 = scmp.lt.s32.totalorder %s1229_s6, %s889_s11 }
  0x7e   : > { %p896_p12 = por %p895_p11, %p894_p10 }
  0x80   : > { %p897_p13 = pnand %p896_p12, %p890_p9 }
  0x82   : > { %900 = shalt.err (!%p897_p13)  }
  0x83   : > { %254 = dma.hbm_to_vmem [thread:$0]  %s242_s10, 16, %s252_s29, [#allocation3] }
  0x84   : > { %s672_s12 = sshll.u32 %s256_s15, 4  ;;  %s1082_s23 = smov [#allocation2 + $0x5]  }
  0x85   : > { %s258_s25 = scalar_lea.hbm %s1372_s1, %s672_s12  ;;  %s283_s14 = sshll.u32 %s1082_s23, 4  ;;  %s284_s14 = int_to_ptr.vmem [resolvable:$true] %s283_s14 }
  0x86   : > { %s901_s20 = scalar_lea.hbm %s258_s25, 16  ;;  %p904_p1 = scmp.lt.s32.totalorder %s258_s25, %s1372_s1 }
  0x87   : > { %p902_p0 = scmp.ne.s32.totalorder %s258_s25, %s901_s20  ;;  %p905_p2 = scmp.lt.s32.totalorder %s1220_s28, %s901_s20 }
  0x89   : > { %p906_p3 = por %p905_p2, %p904_p1 }
  0x8b   : > { %p907_p5 = pnand %p906_p3, %p902_p0 }
  0x8d   : > { %910 = shalt.err (!%p907_p5)  }
  0x8e   : > { %s911_s29 = scalar_lea.vmem %s1268_s2, 16  ;;  %p916_p7 = scmp.lt.s32.totalorder %s1268_s2, %s1205_s0 }
  0x8f   : > { %p912_p6 = scmp.ne.s32.totalorder %s1268_s2, %s911_s29  ;;  %p917_p9 = scmp.lt.s32.totalorder %s1229_s6, %s911_s29 }
  0x91   : > { %p918_p10 = por %p917_p9, %p916_p7 }
  0x93   : > { %p919_p11 = pnand %p918_p10, %p912_p6 }
  0x95   : > { %922 = shalt.err (!%p919_p11)  }
  0x96   : > { %270 = dma.hbm_to_vmem [thread:$0]  %s258_s25, 16, %s1268_s2, [#allocation3] }
  0x97   : > { %s287_s15 = sadd.s32 6, %s1197_s17  ;;  %s673_s10 = sshll.u32 %s1273_s8, 4 }
  0x98   : > { %s288_s9 = sld [smem:[#allocation5 + %s287_s15]]  ;;  %s274_s13 = scalar_lea.hbm %s1372_s1, %s673_s10 }
  0x99   : > { %s923_s19 = scalar_lea.hbm %s274_s13, 16  ;;  %p926_p13 = scmp.lt.s32.totalorder %s274_s13, %s1372_s1 }
  0x9a   : > { %p924_p12 = scmp.ne.s32.totalorder %s274_s13, %s923_s19  ;;  %p927_p0 = scmp.lt.s32.totalorder %s1220_s28, %s923_s19 }
  0x9c   : > { %p928_p1 = por %p927_p0, %p926_p13 }
  0x9e   : > { %p929_p2 = pnand %p928_p1, %p924_p12 }
  0xa0   : > { %932 = shalt.err (!%p929_p2)  }
  0xa1   : > { %s933_s27 = scalar_lea.vmem %s284_s14, 16  ;;  %p938_p5 = scmp.lt.s32.totalorder %s284_s14, %s1205_s0 }
  0xa2   : > { %p934_p3 = scmp.ne.s32.totalorder %s284_s14, %s933_s27  ;;  %p939_p6 = scmp.lt.s32.totalorder %s1229_s6, %s933_s27 }
  0xa4   : > { %p940_p7 = por %p939_p6, %p938_p5 }
  0xa6   : > { %p941_p9 = pnand %p940_p7, %p934_p3 }
  0xa8   : > { %944 = shalt.err (!%p941_p9)  }
  0xa9   : > { %286 = dma.hbm_to_vmem [thread:$0]  %s274_s13, 16, %s284_s14, [#allocation3] }
  0xaa   : > { %s1083_s8 = smov [#allocation2 + $0x6]   ;;  %s303_s25 = sadd.s32 7, %s1197_s17 }
  0xab   : > { %s299_s2 = sshll.u32 %s1083_s8, 4  ;;  %s304_s16 = sld [smem:[#allocation5 + %s303_s25]]  ;;  %s300_s2 = int_to_ptr.vmem [resolvable:$true] %s299_s2 }
  0xac   : > { %s674_s29 = sshll.u32 %s288_s9, 4  ;;  %s1084_s15 = smov [#allocation2 + $0x7]  }
  0xad   : > { %s315_s10 = sshll.u32 %s1084_s15, 4  ;;  %s290_s19 = scalar_lea.hbm %s1372_s1, %s674_s29  ;;  %s316_s10 = int_to_ptr.vmem [resolvable:$true] %s315_s10 }
  0xae   : > { %s945_s23 = scalar_lea.hbm %s290_s19, 16  ;;  %p948_p11 = scmp.lt.s32.totalorder %s290_s19, %s1372_s1 }
  0xaf   : > { %p946_p10 = scmp.ne.s32.totalorder %s290_s19, %s945_s23  ;;  %p949_p12 = scmp.lt.s32.totalorder %s1220_s28, %s945_s23 }
  0xb1   : > { %p950_p13 = por %p949_p12, %p948_p11 }
  0xb3   : > { %p951_p0 = pnand %p950_p13, %p946_p10 }
  0xb5   : > { %954 = shalt.err (!%p951_p0)  }
  0xb6   : > { %s955_s17 = scalar_lea.vmem %s300_s2, 16  ;;  %p960_p2 = scmp.lt.s32.totalorder %s300_s2, %s1205_s0 }
  0xb7   : > { %p956_p1 = scmp.ne.s32.totalorder %s300_s2, %s955_s17  ;;  %p961_p3 = scmp.lt.s32.totalorder %s1229_s6, %s955_s17 }
  0xb9   : > { %p962_p5 = por %p961_p3, %p960_p2 }
  0xbb   : > { %p963_p6 = pnand %p962_p5, %p956_p1 }
  0xbd   : > { %966 = shalt.err (!%p963_p6)  }
  0xbe   : > { %302 = dma.hbm_to_vmem [thread:$0]  %s290_s19, 16, %s300_s2, [#allocation3] }
  0xbf   : > { %s675_s14 = sshll.u32 %s304_s16, 4 }
  0xc0   : > { %s306_s8 = scalar_lea.hbm %s1372_s1, %s675_s14 }
  0xc1   : > { %s967_s25 = scalar_lea.hbm %s306_s8, 16  ;;  %p970_p9 = scmp.lt.s32.totalorder %s306_s8, %s1372_s1 }
  0xc2   : > { %p968_p7 = scmp.ne.s32.totalorder %s306_s8, %s967_s25  ;;  %p971_p10 = scmp.lt.s32.totalorder %s1220_s28, %s967_s25 }
  0xc4   : > { %p972_p11 = por %p971_p10, %p970_p9 }
  0xc6   : > { %p973_p12 = pnand %p972_p11, %p968_p7 }
  0xc8   : > { %976 = shalt.err (!%p973_p12)  }
  0xc9   : > { %s977_s11 = scalar_lea.vmem %s316_s10, 16  ;;  %p982_p0 = scmp.lt.s32.totalorder %s316_s10, %s1205_s0 }
  0xca   : > { %p978_p13 = scmp.ne.s32.totalorder %s316_s10, %s977_s11  ;;  %p983_p1 = scmp.lt.s32.totalorder %s1229_s6, %s977_s11 }
  0xcc   : > { %p984_p2 = por %p983_p1, %p982_p0 }
  0xce   : > { %p985_p3 = pnand %p984_p2, %p978_p13 }
  0xd0   : > { %988 = shalt.err (!%p985_p3)  }
  0xd1   : > { %318 = dma.hbm_to_vmem [thread:$0]  %s306_s8, 16, %s316_s10, [#allocation3] }
  0xd2   : > { %s181_s2 = scalar_lea.vmem [#allocation9], %s1201_s18 }
  0xd3   : > { %1045 = dma.done.wait [#allocation3], 128 }
  0xd4   : > { %1046 = vsyncadd [#allocation3], 4294967168  ;;  %v470_v0 = vld [vmem:[#allocation2] sm:$0xff]  ;;  %v472_v1 = vld [vmem:[#allocation6] sm:$0xff]  ;;  %s695_s16 = sshll.u32 %s1065_s24, 7  ;;  %s518_s10 = sshll.u32 %s181_s2, 4  ;;  %s519_s10 = int_to_ptr.vmem [resolvable:$true] %s518_s10 }
  0xd5   : > { %v473_v2 = vadd.f32 %v472_v1, %v470_v0  ;;  %v692_v11 = vld [vmem:[%s1374_s3] ss:$0 sm:$0xff]  ;;  %s516_s23 = scalar_lea.hbm %s1376_s5, %s695_s16  ;;  %s1391_s20 = sand.u32 1, %s1057_s22  }
  0xd6   : > { %v693_v13 = vld [vmem:[%s1375_s4] ss:$0 sm:$0xff]  ;;  %s504_s27 = scalar_lea.sflag [#allocation8], %s1391_s20  ;;  %s989_s17 = scalar_lea.vmem %s519_s10, 128 }
  0xd7   : > { %474 = vadd.xlane.f32.xlu0 %v473_v2  ;;  %p990_p5 = scmp.ne.s32.totalorder %s519_s10, %s989_s17  ;;  %s1085_s14 = smov [#allocation9]  }
  0xd8   : > { %s993_s9 = sshll.u32 %s1085_s14, 4  ;;  %s994_s9 = int_to_ptr.vmem [resolvable:$false] %s993_s9 }
  0xd9   : > { %p991_p6 = pnand %p990_p5, %p1159_p4  ;;  %s995_s24 = scalar_lea.vmem %s994_s9, 256 }
  0xda   : > { %p996_p9 = scmp.lt.s32.totalorder %s519_s10, %s994_s9  ;;  %p997_p10 = scmp.lt.s32.totalorder %s995_s24, %s989_s17 }
  0xdb   : > { %p992_p7 = pneg %p991_p6 }
  0xdc   : > { %p998_p11 = por %p997_p10, %p996_p9 }
  0xde   : > { %p999_p12 = pnand %p998_p11, %p992_p7 }
 0x160   : > { %v475_v3 = vpop.xlane.xlu0 %474 }
 0x161   : > { %v477_v4 = vmul.f32 0.0078125, %v475_v3 }
 0x163   : > { %v478_v5 = vsub.f32 %v473_v2, %v477_v4 }
 0x165   : > { %v479_v6 = vmul.f32 %v478_v5, %v478_v5 }
 0x167   : > { %480 = vadd.xlane.f32.xlu0 %v479_v6 }
 0x1f0   : > { %v481_v7 = vpop.xlane.xlu0 %480 }
 0x1f1   : > { %v482_v8 = vmul.f32 0.0078125, %v481_v7 }
 0x1f3   : > { %v483_v9 = vadd.f32 1e-05, %v482_v8 }
 0x1f5   : > { %777 = vrsqrt.f32 %v483_v9 }
 0x202   : > { %v778_v10 = vpop.eup %777 }
 0x203   : > { %v485_v12 = vmul.f32 %v778_v10, %v478_v5 }
 0x205   : > { %v493_v14 = vmul.f32 %v692_v11, %v485_v12 }
 0x207   : > { %v501_v15 = vadd.f32 %v693_v13, %v493_v14 }
 0x209   : > { %502 = vst [vmem:[%s181_s2] sm:$0xff] %v501_v15 }
 0x20a   : > { %1002 = shalt.err (!%p999_p12)
}
 0x20b   : > { %s1003_s13 = scalar_lea.hbm %s516_s23, 128  ;;  %s1007_s29 = scalar_lea.hbm %s1376_s5, 256 }
 0x20c   : > { %p1004_p13 = scmp.ne.s32.totalorder %s516_s23, %s1003_s13  ;;  %p1008_p2 = scmp.lt.s32.totalorder %s516_s23, %s1376_s5 }
 0x20d   : > { %p1009_p3 = scmp.lt.s32.totalorder %s1007_s29, %s1003_s13 }
 0x20e   : > { %p1005_p0 = pnand %p1004_p13, %p1159_p4 }
 0x20f   : > { %p1010_p5 = por %p1009_p3, %p1008_p2 }
 0x210   : > { %p1006_p1 = pneg %p1005_p0 }
 0x212   : > { %p1011_p6 = pnand %p1010_p5, %p1006_p1 }
 0x214   : > { %1014 = shalt.err (!%p1011_p6)
}
 0x215   : > { %706 = dma.vmem_to_hbm [thread:$0]  (%p1159_p4), %s519_s10, 128, %s516_s23, %s504_s27  }
 0x216 PF: > { %p718_p7 = scmp.ge.s32.totalorder %s1073_s26, 2  ;;  %s530_s2 = sand.u32 1, %s1053_s21  }
 0x217   : > { %s531_s28 = scalar_lea.sflag [#allocation8], %s530_s2 }
 0x218   : > { %p713_p9 = pnand %p718_p7, %p1166_p8 }
 0x21a   : > { %p714_p10 = pneg %p713_p9 }
 0x21c   : > { %1048 = dma.done.wait (%p714_p10), %s531_s28, 128  }
 0x21d   : > { %1050 = vsyncadd (%p714_p10), %s531_s28, 4294967168  ;;  %s23_s26 = sadd.s32 1, %s1073_s26   ;;  %s1392_s18 = sld [smem:[#allocation48_spill]] }
 0x21e   : > { %p20_p11 = scmp.ge.s32.totalorder %s23_s26, 4   ;;  %s1393_s23 = sld [smem:[#allocation51_spill]] }
 0x21f   : > { %s1394_s24 = sld [smem:[#allocation49_spill]]  ;;  %s1396_s21 = smov %s1057_s22 }
 0x220   : > { %s1395_s25 = sld [smem:[#allocation50_spill]]  ;;  %22 = sbr.rel (!%p20_p11) target bundleno = 11 (0xb), region = 177 }
 0x223   : > { %s1397_s22 = smov %s1392_s18 }
 0x225   :  { %536 = vsyncpa [#allocation7], 1 }
 0x226   :  { %538 = vsyncpa [#allocation7 + $0x1], 1 }
 0x227   :  { %539 = vsyncpa [#allocation8], 1 }
 0x228   :  { %541 = vsyncpa [#allocation8 + $0x1], 1 }
 0x229   :  { %542 = vsyncmov [#allocation3] }
 0x22c   :  { %s543_s30 = vpop.sfrf %542 }
 0x22d   :  { %p698_p4 = scmp.ne.s32.totalorder %s543_s30, 0 }
 0x22f   :  { %547 = shalt.err (%p698_p4)  }
 0x230   :  { %549 = vsyncmov [#allocation3 + $0x1] }
 0x233   :  { %s550_s7 = vpop.sfrf %549 }
 0x234   :  { %p699_p8 = scmp.ne.s32.totalorder %s550_s7, 0 }
 0x236   :  { %554 = shalt.err (%p699_p8)  }

</bundles_post_ra>
